<compile_context>
chip_gen: v6e
topology: v6e:2x2x1
jax: 0.10.0
libtpu: 0.0.40
codegen_flags: <defaults>
</compile_context>

<pallas_src>
import numpy as np
import jax
import jax.numpy as jnp
from jax.experimental import pallas as pl


# ----------------------------- hyper-params ---------------------------------
B = 4            # batch_size
S = 8            # seqlen
M = 16           # memory_size
DK = 16          # q_embed_dim == memory_key_state_dim == final_fc_dim
DV = 32          # qa_embed_dim == memory_value_state_dim
NQ = 10          # n_question

BD_V = B * DV    # 128  (lane-dense width of the carried value memory)
BD_K = B * DK    # 64

# --- packed activation slab layout: shape (32, 128) -------------------------
ACTS_SHAPE = (32, 128)
QT_R, QT_C = 0, 0        # qT      (DK, S*B) = (16, 32)
QR_R, QR_C = 16, 0       # q_rows  (S, B*DK) = (8, 64)
TG_R, TG_C = 16, 64      # target  (S, B)    = (8, 4)
QA_R, QA_C = 24, 0       # qa_rows (S, B*DV) = (8, 128)

# --- packed weight slab layout: shape (264, 384) -----------------------------
WTS_SHAPE = (264, 384)
WEA_R, WEA_C = 0, 0      # fused [erase|add] block-diag (B*DV, 2*B*DV) = (128, 256)
WRR_R, WRR_C = 128, 0    # read half of read_embed, block-diag (B*DV, B*DK) = (128, 64)
WRQ_R, WRQ_C = 128, 64   # q half of read_embed, block-diag    (B*DK, B*DK) = (64, 64)
WP_R, WP_C = 128, 128    # predict_linear, block-diag          (B*DK, B)    = (64, 4)
MK_R, MK_C = 192, 64     # key memory                          (M, DK)      = (16, 16)
MV0_R, MV0_C = 192, 128  # init value memory, batch-tiled      (M, B*DV)    = (16, 128)
E_R, E_C = 208, 128      # block-ones selector                 (B, B*DV)    = (4, 128)
BEA_R, BEA_C = 256, 0    # fused erase/add bias row            (1, 2*B*DV)
BR_R, BR_C = 256, 256    # read_embed bias row                 (1, B*DK)
BP_R, BP_C = 256, 320    # predict bias                        (1, 1)


# ------------------------------ Pallas kernel --------------------------------
def dkvmn_fused_kernel(acts_ref, wts_ref, loss_ref, probs_ref):
    """Entire DKVMN forward: bulk addressing + bulk erase/add projections,
    lane-dense recurrence, fused predict head, and masked BCE loss."""
    f32 = jnp.float32

    # ---- unpack the two packed operands (static VMEM ref slices) ------------
    qT = acts_ref[QT_R:QT_R + DK, QT_C:QT_C + S * B]            # (16, 32)
    q_rows = acts_ref[QR_R:QR_R + S, QR_C:QR_C + BD_K]          # (8, 64)
    tgt = acts_ref[TG_R:TG_R + S, TG_C:TG_C + B]                # (8, 4)
    qa_rows = acts_ref[QA_R:QA_R + S, QA_C:QA_C + BD_V]         # (8, 128)

    wea = wts_ref[WEA_R:WEA_R + BD_V, WEA_C:WEA_C + 2 * BD_V]   # (128, 256)
    wrr = wts_ref[WRR_R:WRR_R + BD_V, WRR_C:WRR_C + BD_K]       # (128, 64)
    wrq = wts_ref[WRQ_R:WRQ_R + BD_K, WRQ_C:WRQ_C + BD_K]       # (64, 64)
    wp = wts_ref[WP_R:WP_R + BD_K, WP_C:WP_C + B]               # (64, 4)
    mk = wts_ref[MK_R:MK_R + M, MK_C:MK_C + DK]                 # (16, 16)
    mem = wts_ref[MV0_R:MV0_R + M, MV0_C:MV0_C + BD_V]          # (16, 128)
    e_sel = wts_ref[E_R:E_R + B, E_C:E_C + BD_V]                # (4, 128)
    bea = wts_ref[BEA_R:BEA_R + 1, BEA_C:BEA_C + 2 * BD_V]      # (1, 256)
    br = wts_ref[BR_R:BR_R + 1, BR_C:BR_C + BD_K]               # (1, 64)
    bp = wts_ref[BP_R:BP_R + 1, BP_C:BP_C + 1]                  # (1, 1)

    ones_m = jnp.ones((1, M), f32)        # hoisted constant (reused below)

    # ---- hoisted bulk addressing: softmax(q @ Mk^T) for ALL timesteps -------
    # wT_all[m, t*B+b] = softmax_m(q[t,b] . mk[m]); sum over m done on the MXU,
    # max-subtraction omitted (scores are O(few), mathematically identical).
    simT = jnp.dot(mk, qT, preferred_element_type=f32)              # (M, S*B)
    exT = jnp.exp(simT)
    denT = jnp.dot(ones_m, exT, preferred_element_type=f32)         # (1, S*B)
    wT_all = exT * pl.reciprocal(denT, approx=True)                 # (M, S*B)

    # ---- hoisted bulk erase/add projections (block-diag fused weight) -------
    ea = jnp.dot(qa_rows, wea, preferred_element_type=f32) + bea    # (8, 256)
    erase_rows = jax.nn.sigmoid(ea[:, :BD_V])                       # (8, 128)
    add_rows = jnp.tanh(ea[:, BD_V:])                               # (8, 128)

    # ---- recurrence: only memory-dependent work (lane-dense (16,128) carry) -
    reads = []
    for t in range(S):
        # expand w_t (B, M) -> (M, B*DV); independent of mem (off critical path)
        w_exp = jnp.dot(wT_all[:, t * B:(t + 1) * B], e_sel,
                        preferred_element_type=f32)                 # (16, 128)
        # read BEFORE write (as in the module); sum over slots via MXU ones-row
        reads.append(jnp.dot(ones_m, w_exp * mem,
                             preferred_element_type=f32))           # (1, 128)
        er = erase_rows[t:t + 1, :]                                 # (1, 128)
        ad = add_rows[t:t + 1, :]                                   # (1, 128)
        # fused gated update: mem*(1 - w*erase) + w*add
        mem = mem + w_exp * (ad - mem * er)

    read_rows = jnp.concatenate(reads, axis=0)                      # (8, 128)

    # ---- fused predict head (rows layout, block-diag weights) ---------------
    h = jnp.tanh(jnp.dot(read_rows, wrr, preferred_element_type=f32)
                 + jnp.dot(q_rows, wrq, preferred_element_type=f32)
                 + br)                                              # (8, 64)
    logits = jnp.dot(h, wp, preferred_element_type=f32) + bp        # (8, 4)
    probs_ref[...] = jax.nn.sigmoid(logits)                         # (S, B)

    # ---- masked BCE-with-logits loss (mean over target >= 0) ----------------
    mask = jnp.where(tgt >= 0.0, 1.0, 0.0)
    per = (jnp.maximum(logits, 0.0) - logits * tgt
           + jnp.log(1.0 + jnp.exp(-jnp.abs(logits))))
    ones_s = jnp.ones((1, S), f32)
    total = jnp.dot(ones_s, jnp.sum(per * mask, axis=1, keepdims=True),
                    preferred_element_type=f32)                     # (1, 1)
    cnt = jnp.dot(ones_s, jnp.sum(mask, axis=1, keepdims=True),
                  preferred_element_type=f32)                       # (1, 1)
    # denominator guard differs from torch only when zero targets are unmasked
    loss_ref[...] = total / jnp.maximum(cnt, 1.0)


# ------------------------------ wrappers -------------------------------------
def dkvmn_predict(acts, wts):
    """Single fused kernel invocation: 2 input DMAs, whole-array VMEM blocks,
    no grid (B=4 -> no benefit from sharding across v7x's two TensorCores)."""
    return pl.pallas_call(
        dkvmn_fused_kernel,
        out_shape=(jax.ShapeDtypeStruct((1, 1), jnp.float32),
                   jax.ShapeDtypeStruct((S, B), jnp.float32)),
    )(acts, wts)


def _pack_weights(params):
    """Pack all weights into one pre-padded VMEM slab (block-diag per batch so
    the kernel can keep everything in lane-dense 'rows' layout).  In a real
    model this slab would be built once per weight update, not per call."""
    f32 = jnp.float32
    eye_b = jnp.eye(B, dtype=f32)
    wea_blk = jnp.concatenate(
        [jnp.kron(eye_b, params["erase_w"].T),
         jnp.kron(eye_b, params["add_w"].T)], axis=1)               # (128, 256)
    bea_row = jnp.concatenate(
        [jnp.tile(params["erase_b"], (1, B)),
         jnp.tile(params["add_b"], (1, B))], axis=1)                # (1, 256)
    wr_t = params["read_embed_w"].T                                 # (DV+DK, DK)
    wrr_blk = jnp.kron(eye_b, wr_t[:DV, :])                         # (128, 64)
    wrq_blk = jnp.kron(eye_b, wr_t[DV:, :])                         # (64, 64)
    wp_blk = jnp.kron(eye_b, params["predict_w"].T)                 # (64, 4)
    mem0 = jnp.tile(params["init_memory_value"], (1, B))            # (16, 128)
    e_sel = jnp.kron(eye_b, jnp.ones((1, DV), f32))                 # (4, 128)
    br_row = jnp.tile(params["read_embed_b"], (1, B))               # (1, 64)

    wts = jnp.zeros(WTS_SHAPE, f32)
    wts = wts.at[WEA_R:WEA_R + BD_V, WEA_C:WEA_C + 2 * BD_V].set(wea_blk)
    wts = wts.at[WRR_R:WRR_R + BD_V, WRR_C:WRR_C + BD_K].set(wrr_blk)
    wts = wts.at[WRQ_R:WRQ_R + BD_K, WRQ_C:WRQ_C + BD_K].set(wrq_blk)
    wts = wts.at[WP_R:WP_R + BD_K, WP_C:WP_C + B].set(wp_blk)
    wts = wts.at[MK_R:MK_R + M, MK_C:MK_C + DK].set(params["init_memory_key"])
    wts = wts.at[MV0_R:MV0_R + M, MV0_C:MV0_C + BD_V].set(mem0)
    wts = wts.at[E_R:E_R + B, E_C:E_C + BD_V].set(e_sel)
    wts = wts.at[BEA_R, BEA_C:BEA_C + 2 * BD_V].set(bea_row[0])
    wts = wts.at[BR_R, BR_C:BR_C + BD_K].set(br_row[0])
    wts = wts.at[BP_R, BP_C].set(params["predict_b"][0, 0])
    return wts


@jax.jit
def _device_forward(params, q_data, qa_data, target):
    """Device-side MODEL.forward: embeddings + layout packing + fused kernel.
    No XLA ops run after the kernel (loss + probabilities come out of it)."""
    q_embed = jnp.take(params["q_embed_w"], q_data, axis=0)      # (B, S, DK)
    qa_embed = jnp.take(params["qa_embed_w"], qa_data, axis=0)   # (B, S, DV)

    q_seq = jnp.transpose(q_embed, (1, 0, 2))                    # (S, B, DK)
    qa_seq = jnp.transpose(qa_embed, (1, 0, 2))                  # (S, B, DV)

    q_t = q_seq.reshape(S * B, DK).T                             # (DK, S*B)
    q_rows = q_seq.reshape(S, BD_K)                              # (8, 64)
    qa_rows = qa_seq.reshape(S, BD_V)                            # (8, 128)
    tgt_sb = jnp.transpose(target.reshape(B, S), (1, 0))         # (S, B)

    acts = jnp.zeros(ACTS_SHAPE, jnp.float32)
    acts = acts.at[QT_R:QT_R + DK, QT_C:QT_C + S * B].set(q_t)
    acts = acts.at[QR_R:QR_R + S, QR_C:QR_C + BD_K].set(q_rows)
    acts = acts.at[TG_R:TG_R + S, TG_C:TG_C + B].set(tgt_sb)
    acts = acts.at[QA_R:QA_R + S, QA_C:QA_C + BD_V].set(qa_rows)

    wts = _pack_weights(params)

    loss, probs_sb = dkvmn_predict(acts, wts)                    # (1,1), (S,B)
    return loss, probs_sb


def model_forward(params, q_data, qa_data, target, input_f):
    """Reproduces MODEL.forward (auto_encoder=False, fuzzy_logic=False,
    feedforward=False)."""
    input_f = input_f.reshape(-1, 1)   # auto_encoder == False path (unused later)

    loss, probs_sb = _device_forward(params, q_data, qa_data, target)

    # TODO(synk): utils.pca_kmeans_tri(all_correlation) has no defined source /
    # Pallas equivalent; with fuzzy_logic=False its output is unused, so the
    # correlation weights stay internal to the kernel.

    # masked_select has a data-dependent output shape -> host glue only for the
    # returned filtered tensors (loss and sigmoid were computed on device).
    probs_np, target_np = jax.device_get((probs_sb, target))
    probs_bs = np.asarray(probs_np).T.reshape(-1)      # reorder to b*S+t (torch order)
    tgt_flat = np.asarray(target_np).reshape(-1)
    sel = tgt_flat >= 0.0
    return loss, probs_bs[sel], tgt_flat[sel]


# ------------------------- deterministic params ------------------------------
def make_params(key):
    ks = jax.random.split(key, 10)

    def kaiming(k, shape, fan_in):
        return (jax.random.normal(k, shape, jnp.float32)
                * jnp.sqrt(2.0 / fan_in))

    q_embed_w = jax.random.normal(ks[0], (NQ + 1, DK), jnp.float32)
    q_embed_w = q_embed_w.at[0].set(0.0)          # padding_idx=0
    qa_embed_w = jax.random.normal(ks[1], (2 * NQ + 1, DV), jnp.float32)
    qa_embed_w = qa_embed_w.at[0].set(0.0)        # padding_idx=0

    # NOTE: input_embed_linear exists in the module but is unused in forward().
    return {
        "q_embed_w": q_embed_w,
        "qa_embed_w": qa_embed_w,
        "init_memory_key": kaiming(ks[2], (M, DK), DK),
        "init_memory_value": kaiming(ks[3], (M, DV), DV),
        "erase_w": kaiming(ks[4], (DV, DV), DV),      # PyTorch (out, in)
        "erase_b": jnp.zeros((1, DV), jnp.float32),
        "add_w": kaiming(ks[5], (DV, DV), DV),
        "add_b": jnp.zeros((1, DV), jnp.float32),
        "read_embed_w": kaiming(ks[6], (DK, DV + DK), DV + DK),
        "read_embed_b": jnp.zeros((1, DK), jnp.float32),
        "predict_w": kaiming(ks[7], (1, DK), DK),
        "predict_b": jnp.zeros((1, 1), jnp.float32),
    }


# --------------------------------- main ---------------------------------------
if __name__ == "__main__":
    key = jax.random.PRNGKey(0)
    kp, k1, k2, k3 = jax.random.split(key, 4)

    params = make_params(kp)

    q_data = jax.random.randint(k1, (B, S), 0, NQ + 1, dtype=jnp.int32)
    qa_data = jax.random.randint(k2, (B, S), 0, 2 * NQ + 1, dtype=jnp.int32)
    # targets in {-1 (masked), 0, 1}
    target = (jax.random.randint(k3, (B * S, 1), -1, 2)).astype(jnp.float32)
    input_f = jnp.zeros((B * S, 1), jnp.float32)

    loss, sig_pred, filt_target = model_forward(
        params, q_data, qa_data, target, input_f)

    jax.block_until_ready(loss)
    loss_val = np.asarray(loss).item()
    assert np.isfinite(loss_val)
    assert sig_pred.shape == filt_target.shape
    print("KERNEL_OK")
</pallas_src>

<mosaic_0001>
module attributes {stable_mosaic.version = 11 : i64} {
  func.func @dkvmn_fused_kernel(%arg0: memref<32x128xf32, #tpu.memory_space<vmem>>, %arg1: memref<264x384xf32, #tpu.memory_space<vmem>>, %arg2: memref<1x1xf32, #tpu.memory_space<vmem>>, %arg3: memref<8x4xf32, #tpu.memory_space<vmem>>) attributes {dimension_semantics = [], scalar_prefetch = 0 : i64, scratch_operands = 0 : i64, tpu.core_type = #tpu.core_type<tc>} {
    %c0 = arith.constant 0 : index
    %c0_0 = arith.constant 0 : index
    %0 = vector.load %arg0[%c0, %c0_0] : memref<32x128xf32, #tpu.memory_space<vmem>>, vector<16x32xf32>
    %c16 = arith.constant 16 : index
    %c0_1 = arith.constant 0 : index
    %1 = vector.load %arg0[%c16, %c0_1] : memref<32x128xf32, #tpu.memory_space<vmem>>, vector<8x64xf32>
    %c16_2 = arith.constant 16 : index
    %c64 = arith.constant 64 : index
    %2 = vector.load %arg0[%c16_2, %c64] : memref<32x128xf32, #tpu.memory_space<vmem>>, vector<8x4xf32>
    %c24 = arith.constant 24 : index
    %c0_3 = arith.constant 0 : index
    %3 = vector.load %arg0[%c24, %c0_3] : memref<32x128xf32, #tpu.memory_space<vmem>>, vector<8x128xf32>
    %c0_4 = arith.constant 0 : index
    %c0_5 = arith.constant 0 : index
    %4 = vector.load %arg1[%c0_4, %c0_5] : memref<264x384xf32, #tpu.memory_space<vmem>>, vector<128x256xf32>
    %c128 = arith.constant 128 : index
    %c0_6 = arith.constant 0 : index
    %5 = vector.load %arg1[%c128, %c0_6] : memref<264x384xf32, #tpu.memory_space<vmem>>, vector<128x64xf32>
    %c128_7 = arith.constant 128 : index
    %c64_8 = arith.constant 64 : index
    %6 = vector.load %arg1[%c128_7, %c64_8] : memref<264x384xf32, #tpu.memory_space<vmem>>, vector<64x64xf32>
    %c128_9 = arith.constant 128 : index
    %c128_10 = arith.constant 128 : index
    %7 = vector.load %arg1[%c128_9, %c128_10] : memref<264x384xf32, #tpu.memory_space<vmem>>, vector<64x4xf32>
    %c192 = arith.constant 192 : index
    %c64_11 = arith.constant 64 : index
    %8 = vector.load %arg1[%c192, %c64_11] : memref<264x384xf32, #tpu.memory_space<vmem>>, vector<16x16xf32>
    %c192_12 = arith.constant 192 : index
    %c128_13 = arith.constant 128 : index
    %9 = vector.load %arg1[%c192_12, %c128_13] : memref<264x384xf32, #tpu.memory_space<vmem>>, vector<16x128xf32>
    %c208 = arith.constant 208 : index
    %c128_14 = arith.constant 128 : index
    %10 = vector.load %arg1[%c208, %c128_14] : memref<264x384xf32, #tpu.memory_space<vmem>>, vector<4x128xf32>
    %c256 = arith.constant 256 : index
    %c0_15 = arith.constant 0 : index
    %11 = vector.load %arg1[%c256, %c0_15] : memref<264x384xf32, #tpu.memory_space<vmem>>, vector<1x256xf32>
    %c256_16 = arith.constant 256 : index
    %c256_17 = arith.constant 256 : index
    %12 = vector.load %arg1[%c256_16, %c256_17] : memref<264x384xf32, #tpu.memory_space<vmem>>, vector<1x64xf32>
    %c256_18 = arith.constant 256 : index
    %c320 = arith.constant 320 : index
    %13 = vector.load %arg1[%c256_18, %c320] : memref<264x384xf32, #tpu.memory_space<vmem>>, vector<1x1xf32>
    %cst = arith.constant 1.000000e+00 : f32
    %14 = vector.broadcast %cst : f32 to vector<1x16xf32>
    %cst_19 = arith.constant dense<0.000000e+00> : vector<16x32xf32>
    %15 = tpu.matmul %8, %0, %cst_19 {dimension_numbers = #tpu.dot_dimension_numbers<[1], [0], [0], [1], [0, 0, 1, 1], [], []>} : vector<16x16xf32>, vector<16x32xf32>, vector<16x32xf32> -> vector<16x32xf32>
    %16 = math.exp %15 : vector<16x32xf32>
    %cst_20 = arith.constant dense<0.000000e+00> : vector<1x32xf32>
    %17 = tpu.matmul %14, %16, %cst_20 {dimension_numbers = #tpu.dot_dimension_numbers<[1], [0], [0], [1], [0, 0, 1, 1], [], []>} : vector<1x16xf32>, vector<16x32xf32>, vector<1x32xf32> -> vector<1x32xf32>
    %18 = tpu.reciprocal %17 {approx = true} : vector<1x32xf32> -> vector<1x32xf32>
    %19 = vector.broadcast %18 : vector<1x32xf32> to vector<16x32xf32>
    %20 = arith.mulf %16, %19 : vector<16x32xf32>
    %cst_21 = arith.constant dense<0.000000e+00> : vector<8x256xf32>
    %21 = tpu.matmul %3, %4, %cst_21 {dimension_numbers = #tpu.dot_dimension_numbers<[1], [0], [0], [1], [0, 0, 1, 1], [], []>} : vector<8x128xf32>, vector<128x256xf32>, vector<8x256xf32> -> vector<8x256xf32>
    %22 = vector.broadcast %11 : vector<1x256xf32> to vector<8x256xf32>
    %23 = arith.addf %21, %22 : vector<8x256xf32>
    %24 = vector.extract_strided_slice %23 {offsets = [0, 0], sizes = [8, 128], strides = [1, 1]} : vector<8x256xf32> to vector<8x128xf32>
    %25 = arith.negf %24 : vector<8x128xf32>
    %26 = math.exp %25 : vector<8x128xf32>
    %cst_22 = arith.constant 1.000000e+00 : f32
    %27 = vector.broadcast %cst_22 : f32 to vector<8x128xf32>
    %28 = arith.addf %27, %26 : vector<8x128xf32>
    %29 = arith.divf %27, %28 : vector<8x128xf32>
    %30 = vector.extract_strided_slice %23 {offsets = [0, 128], sizes = [8, 128], strides = [1, 1]} : vector<8x256xf32> to vector<8x128xf32>
    %31 = math.tanh %30 : vector<8x128xf32>
    %32 = vector.extract_strided_slice %20 {offsets = [0, 0], sizes = [16, 4], strides = [1, 1]} : vector<16x32xf32> to vector<16x4xf32>
    %cst_23 = arith.constant dense<0.000000e+00> : vector<16x128xf32>
    %33 = tpu.matmul %32, %10, %cst_23 {dimension_numbers = #tpu.dot_dimension_numbers<[1], [0], [0], [1], [0, 0, 1, 1], [], []>} : vector<16x4xf32>, vector<4x128xf32>, vector<16x128xf32> -> vector<16x128xf32>
    %34 = arith.mulf %33, %9 : vector<16x128xf32>
    %cst_24 = arith.constant dense<0.000000e+00> : vector<1x128xf32>
    %35 = tpu.matmul %14, %34, %cst_24 {dimension_numbers = #tpu.dot_dimension_numbers<[1], [0], [0], [1], [0, 0, 1, 1], [], []>} : vector<1x16xf32>, vector<16x128xf32>, vector<1x128xf32> -> vector<1x128xf32>
    %36 = vector.extract_strided_slice %29 {offsets = [0, 0], sizes = [1, 128], strides = [1, 1]} : vector<8x128xf32> to vector<1x128xf32>
    %37 = vector.extract_strided_slice %31 {offsets = [0, 0], sizes = [1, 128], strides = [1, 1]} : vector<8x128xf32> to vector<1x128xf32>
    %38 = vector.broadcast %36 : vector<1x128xf32> to vector<16x128xf32>
    %39 = arith.mulf %9, %38 : vector<16x128xf32>
    %40 = vector.broadcast %37 : vector<1x128xf32> to vector<16x128xf32>
    %41 = arith.subf %40, %39 : vector<16x128xf32>
    %42 = arith.mulf %33, %41 : vector<16x128xf32>
    %43 = arith.addf %9, %42 : vector<16x128xf32>
    %44 = vector.extract_strided_slice %20 {offsets = [0, 4], sizes = [16, 4], strides = [1, 1]} : vector<16x32xf32> to vector<16x4xf32>
    %cst_25 = arith.constant dense<0.000000e+00> : vector<16x128xf32>
    %45 = tpu.matmul %44, %10, %cst_25 {dimension_numbers = #tpu.dot_dimension_numbers<[1], [0], [0], [1], [0, 0, 1, 1], [], []>} : vector<16x4xf32>, vector<4x128xf32>, vector<16x128xf32> -> vector<16x128xf32>
    %46 = arith.mulf %45, %43 : vector<16x128xf32>
    %cst_26 = arith.constant dense<0.000000e+00> : vector<1x128xf32>
    %47 = tpu.matmul %14, %46, %cst_26 {dimension_numbers = #tpu.dot_dimension_numbers<[1], [0], [0], [1], [0, 0, 1, 1], [], []>} : vector<1x16xf32>, vector<16x128xf32>, vector<1x128xf32> -> vector<1x128xf32>
    %48 = vector.extract_strided_slice %29 {offsets = [1, 0], sizes = [1, 128], strides = [1, 1]} : vector<8x128xf32> to vector<1x128xf32>
    %49 = vector.extract_strided_slice %31 {offsets = [1, 0], sizes = [1, 128], strides = [1, 1]} : vector<8x128xf32> to vector<1x128xf32>
    %50 = vector.broadcast %48 : vector<1x128xf32> to vector<16x128xf32>
    %51 = arith.mulf %43, %50 : vector<16x128xf32>
    %52 = vector.broadcast %49 : vector<1x128xf32> to vector<16x128xf32>
    %53 = arith.subf %52, %51 : vector<16x128xf32>
    %54 = arith.mulf %45, %53 : vector<16x128xf32>
    %55 = arith.addf %43, %54 : vector<16x128xf32>
    %56 = vector.extract_strided_slice %20 {offsets = [0, 8], sizes = [16, 4], strides = [1, 1]} : vector<16x32xf32> to vector<16x4xf32>
    %cst_27 = arith.constant dense<0.000000e+00> : vector<16x128xf32>
    %57 = tpu.matmul %56, %10, %cst_27 {dimension_numbers = #tpu.dot_dimension_numbers<[1], [0], [0], [1], [0, 0, 1, 1], [], []>} : vector<16x4xf32>, vector<4x128xf32>, vector<16x128xf32> -> vector<16x128xf32>
    %58 = arith.mulf %57, %55 : vector<16x128xf32>
    %cst_28 = arith.constant dense<0.000000e+00> : vector<1x128xf32>
    %59 = tpu.matmul %14, %58, %cst_28 {dimension_numbers = #tpu.dot_dimension_numbers<[1], [0], [0], [1], [0, 0, 1, 1], [], []>} : vector<1x16xf32>, vector<16x128xf32>, vector<1x128xf32> -> vector<1x128xf32>
    %60 = vector.extract_strided_slice %29 {offsets = [2, 0], sizes = [1, 128], strides = [1, 1]} : vector<8x128xf32> to vector<1x128xf32>
    %61 = vector.extract_strided_slice %31 {offsets = [2, 0], sizes = [1, 128], strides = [1, 1]} : vector<8x128xf32> to vector<1x128xf32>
    %62 = vector.broadcast %60 : vector<1x128xf32> to vector<16x128xf32>
    %63 = arith.mulf %55, %62 : vector<16x128xf32>
    %64 = vector.broadcast %61 : vector<1x128xf32> to vector<16x128xf32>
    %65 = arith.subf %64, %63 : vector<16x128xf32>
    %66 = arith.mulf %57, %65 : vector<16x128xf32>
    %67 = arith.addf %55, %66 : vector<16x128xf32>
    %68 = vector.extract_strided_slice %20 {offsets = [0, 12], sizes = [16, 4], strides = [1, 1]} : vector<16x32xf32> to vector<16x4xf32>
    %cst_29 = arith.constant dense<0.000000e+00> : vector<16x128xf32>
    %69 = tpu.matmul %68, %10, %cst_29 {dimension_numbers = #tpu.dot_dimension_numbers<[1], [0], [0], [1], [0, 0, 1, 1], [], []>} : vector<16x4xf32>, vector<4x128xf32>, vector<16x128xf32> -> vector<16x128xf32>
    %70 = arith.mulf %69, %67 : vector<16x128xf32>
    %cst_30 = arith.constant dense<0.000000e+00> : vector<1x128xf32>
    %71 = tpu.matmul %14, %70, %cst_30 {dimension_numbers = #tpu.dot_dimension_numbers<[1], [0], [0], [1], [0, 0, 1, 1], [], []>} : vector<1x16xf32>, vector<16x128xf32>, vector<1x128xf32> -> vector<1x128xf32>
    %72 = vector.extract_strided_slice %29 {offsets = [3, 0], sizes = [1, 128], strides = [1, 1]} : vector<8x128xf32> to vector<1x128xf32>
    %73 = vector.extract_strided_slice %31 {offsets = [3, 0], sizes = [1, 128], strides = [1, 1]} : vector<8x128xf32> to vector<1x128xf32>
    %74 = vector.broadcast %72 : vector<1x128xf32> to vector<16x128xf32>
    %75 = arith.mulf %67, %74 : vector<16x128xf32>
    %76 = vector.broadcast %73 : vector<1x128xf32> to vector<16x128xf32>
    %77 = arith.subf %76, %75 : vector<16x128xf32>
    %78 = arith.mulf %69, %77 : vector<16x128xf32>
    %79 = arith.addf %67, %78 : vector<16x128xf32>
    %80 = vector.extract_strided_slice %20 {offsets = [0, 16], sizes = [16, 4], strides = [1, 1]} : vector<16x32xf32> to vector<16x4xf32>
    %cst_31 = arith.constant dense<0.000000e+00> : vector<16x128xf32>
    %81 = tpu.matmul %80, %10, %cst_31 {dimension_numbers = #tpu.dot_dimension_numbers<[1], [0], [0], [1], [0, 0, 1, 1], [], []>} : vector<16x4xf32>, vector<4x128xf32>, vector<16x128xf32> -> vector<16x128xf32>
    %82 = arith.mulf %81, %79 : vector<16x128xf32>
    %cst_32 = arith.constant dense<0.000000e+00> : vector<1x128xf32>
    %83 = tpu.matmul %14, %82, %cst_32 {dimension_numbers = #tpu.dot_dimension_numbers<[1], [0], [0], [1], [0, 0, 1, 1], [], []>} : vector<1x16xf32>, vector<16x128xf32>, vector<1x128xf32> -> vector<1x128xf32>
    %84 = vector.extract_strided_slice %29 {offsets = [4, 0], sizes = [1, 128], strides = [1, 1]} : vector<8x128xf32> to vector<1x128xf32>
    %85 = vector.extract_strided_slice %31 {offsets = [4, 0], sizes = [1, 128], strides = [1, 1]} : vector<8x128xf32> to vector<1x128xf32>
    %86 = vector.broadcast %84 : vector<1x128xf32> to vector<16x128xf32>
    %87 = arith.mulf %79, %86 : vector<16x128xf32>
    %88 = vector.broadcast %85 : vector<1x128xf32> to vector<16x128xf32>
    %89 = arith.subf %88, %87 : vector<16x128xf32>
    %90 = arith.mulf %81, %89 : vector<16x128xf32>
    %91 = arith.addf %79, %90 : vector<16x128xf32>
    %92 = vector.extract_strided_slice %20 {offsets = [0, 20], sizes = [16, 4], strides = [1, 1]} : vector<16x32xf32> to vector<16x4xf32>
    %cst_33 = arith.constant dense<0.000000e+00> : vector<16x128xf32>
    %93 = tpu.matmul %92, %10, %cst_33 {dimension_numbers = #tpu.dot_dimension_numbers<[1], [0], [0], [1], [0, 0, 1, 1], [], []>} : vector<16x4xf32>, vector<4x128xf32>, vector<16x128xf32> -> vector<16x128xf32>
    %94 = arith.mulf %93, %91 : vector<16x128xf32>
    %cst_34 = arith.constant dense<0.000000e+00> : vector<1x128xf32>
    %95 = tpu.matmul %14, %94, %cst_34 {dimension_numbers = #tpu.dot_dimension_numbers<[1], [0], [0], [1], [0, 0, 1, 1], [], []>} : vector<1x16xf32>, vector<16x128xf32>, vector<1x128xf32> -> vector<1x128xf32>
    %96 = vector.extract_strided_slice %29 {offsets = [5, 0], sizes = [1, 128], strides = [1, 1]} : vector<8x128xf32> to vector<1x128xf32>
    %97 = vector.extract_strided_slice %31 {offsets = [5, 0], sizes = [1, 128], strides = [1, 1]} : vector<8x128xf32> to vector<1x128xf32>
    %98 = vector.broadcast %96 : vector<1x128xf32> to vector<16x128xf32>
    %99 = arith.mulf %91, %98 : vector<16x128xf32>
    %100 = vector.broadcast %97 : vector<1x128xf32> to vector<16x128xf32>
    %101 = arith.subf %100, %99 : vector<16x128xf32>
    %102 = arith.mulf %93, %101 : vector<16x128xf32>
    %103 = arith.addf %91, %102 : vector<16x128xf32>
    %104 = vector.extract_strided_slice %20 {offsets = [0, 24], sizes = [16, 4], strides = [1, 1]} : vector<16x32xf32> to vector<16x4xf32>
    %cst_35 = arith.constant dense<0.000000e+00> : vector<16x128xf32>
    %105 = tpu.matmul %104, %10, %cst_35 {dimension_numbers = #tpu.dot_dimension_numbers<[1], [0], [0], [1], [0, 0, 1, 1], [], []>} : vector<16x4xf32>, vector<4x128xf32>, vector<16x128xf32> -> vector<16x128xf32>
    %106 = arith.mulf %105, %103 : vector<16x128xf32>
    %cst_36 = arith.constant dense<0.000000e+00> : vector<1x128xf32>
    %107 = tpu.matmul %14, %106, %cst_36 {dimension_numbers = #tpu.dot_dimension_numbers<[1], [0], [0], [1], [0, 0, 1, 1], [], []>} : vector<1x16xf32>, vector<16x128xf32>, vector<1x128xf32> -> vector<1x128xf32>
    %108 = vector.extract_strided_slice %29 {offsets = [6, 0], sizes = [1, 128], strides = [1, 1]} : vector<8x128xf32> to vector<1x128xf32>
    %109 = vector.extract_strided_slice %31 {offsets = [6, 0], sizes = [1, 128], strides = [1, 1]} : vector<8x128xf32> to vector<1x128xf32>
    %110 = vector.broadcast %108 : vector<1x128xf32> to vector<16x128xf32>
    %111 = arith.mulf %103, %110 : vector<16x128xf32>
    %112 = vector.broadcast %109 : vector<1x128xf32> to vector<16x128xf32>
    %113 = arith.subf %112, %111 : vector<16x128xf32>
    %114 = arith.mulf %105, %113 : vector<16x128xf32>
    %115 = arith.addf %103, %114 : vector<16x128xf32>
    %116 = vector.extract_strided_slice %20 {offsets = [0, 28], sizes = [16, 4], strides = [1, 1]} : vector<16x32xf32> to vector<16x4xf32>
    %cst_37 = arith.constant dense<0.000000e+00> : vector<16x128xf32>
    %117 = tpu.matmul %116, %10, %cst_37 {dimension_numbers = #tpu.dot_dimension_numbers<[1], [0], [0], [1], [0, 0, 1, 1], [], []>} : vector<16x4xf32>, vector<4x128xf32>, vector<16x128xf32> -> vector<16x128xf32>
    %118 = arith.mulf %117, %115 : vector<16x128xf32>
    %cst_38 = arith.constant dense<0.000000e+00> : vector<1x128xf32>
    %119 = tpu.matmul %14, %118, %cst_38 {dimension_numbers = #tpu.dot_dimension_numbers<[1], [0], [0], [1], [0, 0, 1, 1], [], []>} : vector<1x16xf32>, vector<16x128xf32>, vector<1x128xf32> -> vector<1x128xf32>
    %120 = tpu.concatenate %35, %47, %59, %71, %83, %95, %107, %119 in 0 : vector<1x128xf32>, vector<1x128xf32>, vector<1x128xf32>, vector<1x128xf32>, vector<1x128xf32>, vector<1x128xf32>, vector<1x128xf32>, vector<1x128xf32> -> vector<8x128xf32>
    %cst_39 = arith.constant dense<0.000000e+00> : vector<8x64xf32>
    %121 = tpu.matmul %120, %5, %cst_39 {dimension_numbers = #tpu.dot_dimension_numbers<[1], [0], [0], [1], [0, 0, 1, 1], [], []>} : vector<8x128xf32>, vector<128x64xf32>, vector<8x64xf32> -> vector<8x64xf32>
    %cst_40 = arith.constant dense<0.000000e+00> : vector<8x64xf32>
    %122 = tpu.matmul %1, %6, %cst_40 {dimension_numbers = #tpu.dot_dimension_numbers<[1], [0], [0], [1], [0, 0, 1, 1], [], []>} : vector<8x64xf32>, vector<64x64xf32>, vector<8x64xf32> -> vector<8x64xf32>
    %123 = arith.addf %121, %122 : vector<8x64xf32>
    %124 = vector.broadcast %12 : vector<1x64xf32> to vector<8x64xf32>
    %125 = arith.addf %123, %124 : vector<8x64xf32>
    %126 = math.tanh %125 : vector<8x64xf32>
    %cst_41 = arith.constant dense<0.000000e+00> : vector<8x4xf32>
    %127 = tpu.matmul %126, %7, %cst_41 {dimension_numbers = #tpu.dot_dimension_numbers<[1], [0], [0], [1], [0, 0, 1, 1], [], []>} : vector<8x64xf32>, vector<64x4xf32>, vector<8x4xf32> -> vector<8x4xf32>
    %128 = vector.broadcast %13 : vector<1x1xf32> to vector<8x4xf32>
    %129 = arith.addf %127, %128 : vector<8x4xf32>
    %130 = arith.negf %129 : vector<8x4xf32>
    %131 = math.exp %130 : vector<8x4xf32>
    %cst_42 = arith.constant 1.000000e+00 : f32
    %132 = vector.broadcast %cst_42 : f32 to vector<8x4xf32>
    %133 = arith.addf %132, %131 : vector<8x4xf32>
    %134 = arith.divf %132, %133 : vector<8x4xf32>
    %c0_43 = arith.constant 0 : index
    %c0_44 = arith.constant 0 : index
    %135 = vector.load %arg3[%c0_43, %c0_44] : memref<8x4xf32, #tpu.memory_space<vmem>>, vector<8x4xf32>
    tpu.vector_store %arg3[%c0_43, %c0_44], %134 {strides = array<i32>} : memref<8x4xf32, #tpu.memory_space<vmem>>, vector<8x4xf32>,
    %cst_45 = arith.constant 0.000000e+00 : f32
    %136 = vector.broadcast %cst_45 : f32 to vector<8x4xf32>
    %137 = arith.cmpf oge, %2, %136 : vector<8x4xf32>
    %cst_46 = arith.constant 1.000000e+00 : f32
    %cst_47 = arith.constant 0.000000e+00 : f32
    %138 = vector.broadcast %cst_46 : f32 to vector<8x4xf32>
    %139 = vector.broadcast %cst_47 : f32 to vector<8x4xf32>
    %140 = arith.select %137, %138, %139 : vector<8x4xi1>, vector<8x4xf32>
    %cst_48 = arith.constant 0.000000e+00 : f32
    %141 = vector.broadcast %cst_48 : f32 to vector<8x4xf32>
    %142 = arith.maximumf %129, %141 : vector<8x4xf32>
    %143 = arith.mulf %129, %2 : vector<8x4xf32>
    %144 = arith.subf %142, %143 : vector<8x4xf32>
    %145 = math.absf %129 : vector<8x4xf32>
    %cst_49 = arith.constant 0.000000e+00 : f32
    %146 = vector.broadcast %cst_49 : f32 to vector<8x4xf32>
    %147 = arith.subf %146, %145 : vector<8x4xf32>
    %148 = math.exp %147 : vector<8x4xf32>
    %cst_50 = arith.constant 1.000000e+00 : f32
    %149 = vector.broadcast %cst_50 : f32 to vector<8x4xf32>
    %150 = arith.addf %149, %148 : vector<8x4xf32>
    %151 = math.log %150 : vector<8x4xf32>
    %152 = arith.addf %144, %151 : vector<8x4xf32>
    %cst_51 = arith.constant 1.000000e+00 : f32
    %153 = vector.broadcast %cst_51 : f32 to vector<1x8xf32>
    %154 = arith.mulf %152, %140 : vector<8x4xf32>
    %cst_52 = arith.constant dense<0.000000e+00> : vector<8xf32>
    %155 = vector.multi_reduction <add>, %154, %cst_52 [1] : vector<8x4xf32> to vector<8xf32>
    %156 = vector.shape_cast %155 : vector<8xf32> to vector<8x1xf32>
    %cst_53 = arith.constant dense<0.000000e+00> : vector<1x1xf32>
    %157 = tpu.matmul %153, %156, %cst_53 {dimension_numbers = #tpu.dot_dimension_numbers<[1], [0], [0], [1], [0, 0, 1, 1], [], []>} : vector<1x8xf32>, vector<8x1xf32>, vector<1x1xf32> -> vector<1x1xf32>
    %cst_54 = arith.constant dense<0.000000e+00> : vector<8xf32>
    %158 = vector.multi_reduction <add>, %140, %cst_54 [1] : vector<8x4xf32> to vector<8xf32>
    %159 = vector.shape_cast %158 : vector<8xf32> to vector<8x1xf32>
    %cst_55 = arith.constant dense<0.000000e+00> : vector<1x1xf32>
    %160 = tpu.matmul %153, %159, %cst_55 {dimension_numbers = #tpu.dot_dimension_numbers<[1], [0], [0], [1], [0, 0, 1, 1], [], []>} : vector<1x8xf32>, vector<8x1xf32>, vector<1x1xf32> -> vector<1x1xf32>
    %cst_56 = arith.constant 1.000000e+00 : f32
    %161 = vector.broadcast %cst_56 : f32 to vector<1x1xf32>
    %162 = arith.maximumf %160, %161 : vector<1x1xf32>
    %163 = arith.divf %157, %162 : vector<1x1xf32>
    %c0_57 = arith.constant 0 : index
    %c0_58 = arith.constant 0 : index
    %164 = vector.load %arg2[%c0_57, %c0_58] : memref<1x1xf32, #tpu.memory_space<vmem>>, vector<1x1xf32>
    tpu.vector_store %arg2[%c0_57, %c0_58], %163 {strides = array<i32>} : memref<1x1xf32, #tpu.memory_space<vmem>>, vector<1x1xf32>,
    return
  }
}

</mosaic_0001>

<bundles_post_ra>
// kernel: _device_forward.1
= control target key start
LH: loop header
LB: loop body
LE: loop exit
PB: predicated region body
PF: predicated region fallthrough
CT: control target
= control target key end

     0   :  { %s2573_s16 = smov 64   ;;  %s3075_s0 = inlined_call_operand.vmem [shape: f32[32,128], index: 0, kind: input, shape index: {}]   ;;  %s3076_s1 = inlined_call_operand.vmem [shape: f32[264,384], index: 1, kind: input, shape index: {}]   ;;  %s3077_s2 = inlined_call_operand.hbm [shape: f32[1,1], index: 2, kind: output, shape index: {0}]   ;;  %s3078_s3 = inlined_call_operand.vmem [shape: f32[8,4], index: 3, kind: output, shape index: {1}]  }
   0x1   :  { %v2609_v0 = vld [vmem:[%s3076_s1 + $0x240] sm:$0xff]  ;;  %v15_v1 = vld [vmem:[%s3075_s0 + $0x8] sm:$0xff] }
   0x2   :  { %82 = vrot.lane.b32.xlu0 %v2609_v0, %s2573_s16  ;;  %2320 = vmatprep.subr.mxu0 %v15_v1  ;;  %v14_v2 = vld [vmem:[%s3075_s0] sm:$0xff] }
   0x3   :  { %9 = vsyncpa [#allocation3], 0  ;;  %v2622_v3 = vld [vmem:[%s3076_s1 + $0x258] sm:$0xff]  ;;  %2321 = vmatpush3.msra.mxu0 %v15_v1  ;;  %vm86_vm0 = vcmask 130048   ;;  %v2574_v6 = vmov 0.0   ;;  %vm2575_vm1 = vmmov 0   ;;  %v244_v50 = vlaneseq }
   0x4   :  { %2322 = vmatprep.subr.mxu0 %v14_v2  ;;  %2327 = vmatprep.subr.mxu1 %v2574_v6  ;;  %v49_v7 = vld [vmem:[%s3076_s1 + $0x170] sm:$0xff]  ;;  %v48_v8 = vld [vmem:[%s3076_s1 + $0x168] sm:$0xff]  ;;  %v47_v9 = vld [vmem:[%s3076_s1 + $0x158] sm:$0xff]  ;;  %v2576_v46 = vmov 1.0   ;;  %vm346_vm2 = vcmask 1043456   ;;  %vm339_vm3 = vcmask 31744  }
   0x5   :  { %2323 = vmatpush3.msra.mxu0 %v14_v2  ;;  %2331 = vmatprep.mubr.msk.f32.mxu1 %vm2575_vm1, %v2574_v6  ;;  %v46_v10 = vld [vmem:[%s3076_s1 + $0x150] sm:$0xff]  ;;  %v45_v11 = vld [vmem:[%s3076_s1 + $0x140] sm:$0xff]  ;;  %v44_v12 = vld [vmem:[%s3076_s1 + $0x138] sm:$0xff]  ;;  %v2750_v51 = vshrl.u32 %v244_v50, 7  ;;  %s2577_s10 = smov 120   ;;  %s2578_s11 = smov 124  }
   0x6   :  { %84 = vrot.lane.b32.xlu0 %v2622_v3, %s2573_s16  ;;  %261 = vmatprep.subr.mxu0 %v49_v7  ;;  %v43_v13 = vld [vmem:[%s3076_s1 + $0x128] sm:$0xff]  ;;  %v42_v14 = vld [vmem:[%s3076_s1 + $0x120] sm:$0xff]  ;;  %v41_v15 = vld [vmem:[%s3076_s1 + $0x110] sm:$0xff]  ;;  %s2579_s12 = smov 116   ;;  %s2580_s13 = smov 112   ;;  %vm1715_vm4 = vcmask 1040384  }
   0x7   :  { %v40_v16 = vld [vmem:[%s3076_s1 + $0x108] sm:$0xff]  ;;  %v39_v17 = vld [vmem:[%s3076_s1 + $0xf8] sm:$0xff]  ;;  %v38_v18 = vld [vmem:[%s3076_s1 + $0xf0] sm:$0xff]  ;;  %v2753_v52 = vsub.s32 0, %v2750_v51  ;;  %s2581_s14 = smov 108   ;;  %s2582_s15 = smov 104  }
   0x8   :  { %v37_v19 = vld [vmem:[%s3076_s1 + $0xe0] sm:$0xff]  ;;  %v36_v20 = vld [vmem:[%s3076_s1 + $0xd8] sm:$0xff]  ;;  %v35_v21 = vld [vmem:[%s3076_s1 + $0xc8] sm:$0xff]  ;;  %s2583_s17 = smov 100   ;;  %vm1717_vm5 = vcmask 1041408   ;;  %vm1760_vm6 = vcmask 523264  }
   0x9   :  { %v34_v22 = vld [vmem:[%s3076_s1 + $0xc0] sm:$0xff]  ;;  %v33_v23 = vld [vmem:[%s3076_s1 + $0xb0] sm:$0xff]  ;;  %v32_v24 = vld [vmem:[%s3076_s1 + $0xa8] sm:$0xff]  ;;  %vm1719_vm7 = vcmask 1042432   ;;  %vm1722_vm8 = vcmask 1044480   ;;  %vm1724_vm9 = vcmask 1045504  }
   0xa   :  { %v31_v25 = vld [vmem:[%s3076_s1 + $0x98] sm:$0xff]  ;;  %v30_v26 = vld [vmem:[%s3076_s1 + $0x90] sm:$0xff]  ;;  %v29_v27 = vld [vmem:[%s3076_s1 + $0x80] sm:$0xff]  ;;  %vm1726_vm10 = vcmask 1046528   ;;  %vm2015_vm12 = vcmask 64512   ;;  %vm2164_vm13 = vcmask 0  }
   0xb   :  { %v28_v28 = vld [vmem:[%s3076_s1 + $0x78] sm:$0xff]  ;;  %v27_v29 = vld [vmem:[%s3076_s1 + $0x68] sm:$0xff]  ;;  %v26_v30 = vld [vmem:[%s3076_s1 + $0x60] sm:$0xff] }
   0xc   :  { %v25_v31 = vld [vmem:[%s3076_s1 + $0x50] sm:$0xff]  ;;  %v24_v32 = vld [vmem:[%s3076_s1 + $0x48] sm:$0xff]  ;;  %v23_v33 = vld [vmem:[%s3076_s1 + $0x38] sm:$0xff] }
   0xd   :  { %v22_v34 = vld [vmem:[%s3076_s1 + $0x30] sm:$0xff]  ;;  %v21_v35 = vld [vmem:[%s3076_s1 + $0x20] sm:$0xff]  ;;  %v20_v36 = vld [vmem:[%s3076_s1 + $0x18] sm:$0xff] }
   0xe   :  { %v19_v37 = vld [vmem:[%s3076_s1 + $0x8] sm:$0xff]  ;;  %v18_v38 = vld [vmem:[%s3076_s1] sm:$0xff]  ;;  %v17_v39 = vld [vmem:[%s3075_s0 + $0x18] sm:$0xff] }
   0xf   :  { %v2737_v47 = vld [vmem:[%s3076_s1 + $0x278] sm:$0xf] }
  0x74   :  { %v83_v4 = vpop.permute.xlu0 %82 }
  0x75   :  { %2324 = vmatprep.mubr.msk.f32.mxu0 %vm86_vm0, %v83_v4 }
  0x78   :  { %v85_v5 = vpop.permute.xlu0 %84 }
  0x79   :  { %2325 = vmatmul.mubr.msk.f32.vlgmr.msra.gmra.mxu0 %vm86_vm0, %v85_v5 }
  0x7a   :  { %325 = vmatprep.mubr.f32.mxu0 %v2574_v6  ;;  %262 = vmatpush1.msra.mxu0 %v48_v8 }
  0x7b   :  { %263 = vmatprep.subr.mxu0 %v47_v9 }
  0x7c   :  { %264 = vmatpush1.msra.mxu0 %v46_v10  ;;  %v75_v10 = vld [vmem:[%s3076_s1 + $0x260] sm:$0xff] }
  0x7d   :  { %265 = vmatprep.subr.mxu0 %v45_v11 }
  0x7e   :  { %266 = vmatpush1.msra.mxu0 %v44_v12 }
  0x7f   :  { %267 = vmatprep.subr.mxu0 %v43_v13  ;;  %v74_v13 = vld [vmem:[%s3076_s1 + $0x248] sm:$0xff] }
  0x80   :  { %268 = vmatpush1.msra.mxu0 %v42_v14 }
  0x81   :  { %269 = vmatprep.subr.mxu0 %v41_v15 }
  0x82   :  { %270 = vmatpush1.msra.mxu0 %v40_v16  ;;  %v2184_v16 = vld [vmem:[%s3076_s1 + $0x300] ss:$8 sm:$0x3] }
  0x83   :  { %271 = vmatprep.subr.mxu0 %v39_v17  ;;  %v254_v17 = vrot.slane %v2184_v16, %v2753_v52 }
  0x84   :  { %272 = vmatpush1.msra.mxu0 %v38_v18 }
  0x85   :  { %273 = vmatprep.subr.mxu0 %v37_v19 }
  0x86   :  { %274 = vmatpush1.msra.mxu0 %v36_v20 }
  0x87   :  { %275 = vmatprep.subr.mxu0 %v35_v21  ;;  %v257_v21 = vsub.s32 1, %v2750_v51 }
  0x88   :  { %276 = vmatpush1.msra.mxu0 %v34_v22 }
  0x89   :  { %277 = vmatprep.subr.mxu0 %v33_v23 }
  0x8a   :  { %278 = vmatpush1.msra.mxu0 %v32_v24  ;;  %v258_v24 = vrot.slane %v2184_v16, %v257_v21 }
  0x8b   :  { %279 = vmatprep.subr.mxu0 %v31_v25 }
  0x8c   :  { %280 = vmatpush1.msra.mxu0 %v30_v26 }
  0x8d   :  { %281 = vmatprep.subr.mxu0 %v29_v27 }
  0x8e   :  { %282 = vmatpush1.msra.mxu0 %v28_v28 }
  0x8f   :  { %283 = vmatprep.subr.mxu0 %v27_v29 }
  0x90   :  { %284 = vmatpush1.msra.mxu0 %v26_v30 }
  0x91   :  { %285 = vmatprep.subr.mxu0 %v25_v31 }
  0x92   :  { %286 = vmatpush1.msra.mxu0 %v24_v32 }
  0x93   :  { %287 = vmatprep.subr.mxu0 %v23_v33 }
  0x94   :  { %288 = vmatpush1.msra.mxu0 %v22_v34 }
  0x95   :  { %289 = vmatprep.subr.mxu0 %v21_v35 }
  0x96   :  { %290 = vmatpush1.msra.mxu0 %v20_v36 }
  0x97   :  { %291 = vmatprep.subr.mxu0 %v19_v37 }
  0x98   :  { %292 = vmatpush1.msra.mxu0 %v18_v38 }
  0x99   :  { %326 = vmatmul.mubr.f32.vlgmr.msra.gmra.mxu0 %v17_v39  ;;  %2382 = vmatprep.subr.msk.mxu0 %vm346_vm2, %v2737_v47 }
  0x9a   :  { %2383 = vmatpush3.msk.msra.mxu0 %vm346_vm2, %v2737_v47 }
  0x9b   :  { %2394 = vmatprep.subr.msk.mxu0 %vm346_vm2, %v2737_v47 }
 0x139   :  { %v2326_v40 = vpop.f32.mrf.mxu0 }
 0x13a   :  { %v168_v41 = vmul.f32 1.442695, %v2326_v40 }
 0x13b   :  { %v157_v42 = vpop.f32.mrf.mxu0 }
 0x13c   :  { %2527 = vpow2.f32 %v168_v41  ;;  %v166_v43 = vmul.f32 1.442695, %v157_v42 }
 0x13e   :  { %2529 = vpow2.f32 %v166_v43 }
 0x149   :  { %v2528_v44 = vpop.eup %2527 }
 0x14a   :  { %2328 = vmatpush3.msra.mxu1 %v2528_v44 }
 0x14b   :  { %v2530_v45 = vpop.eup %2529  ;;  %2329 = vmatprep.subr.mxu1 %v2574_v6 }
 0x14c   :  { %2330 = vmatpush3.msra.mxu1 %v2530_v45 }
 0x14d   :  { %2332 = vmatmul.mubr.msk.f32.vlgmr.msra.gmra.mxu1 %vm86_vm0, %v2576_v46  ;;  %2334 = vmatprep.subr.msk.mxu1 %vm346_vm2, %v2737_v47 }
 0x14e   :  { %2335 = vmatpush3.msk.msra.mxu1 %vm346_vm2, %v2737_v47 }
 0x14f   :  { %2339 = vmatprep.subr.mxu1 %v2574_v6 }
 0x159   :  { %v327_v18 = vpop.f32.mrf.mxu0 }
 0x15a   :  { %v328_v19 = vadd.f32 %v327_v18, %v254_v17 }
 0x15b   :  { %v329_v25 = vpop.f32.mrf.mxu0 }
 0x15c   :  { %v2188_v20 = vmul.f32 -1.442695, %v328_v19  ;;  %v330_v26 = vadd.f32 %v329_v25, %v258_v24 }
 0x20d   :  { %v239_v48 = vpop.f32.mrf.mxu1 }
 0x20e   :  { %2531 = vrcp.f32 %v239_v48 }
 0x20f   :  { %v2333_v49 = vpop.f32.mrf.mxu1  ;;  %2533 = vpow2.f32 %v2188_v20  ;;  %v1012_v20 = vsub.s32 3, %v2750_v51 }
 0x21b   :  { %v2532_v53 = vpop.eup %2531 }
 0x21c   :  { %v247_v54 = vrot.slane %v2532_v53, %v2753_v52  ;;  %v2534_v22 = vpop.eup %2533 }
 0x21d   :  { %v335_v23 = vadd.f32 1.0, %v2534_v22 }
 0x21e   :  { %v248_v55 = vmul.f32 %v2530_v45, %v247_v54  ;;  %v249_v56 = vmul.f32 %v2528_v44, %v247_v54 }
 0x21f   :  { %2535 = vrcp.f32 %v335_v23 }
 0x220   :  { %684 = vrot.lane.b32.xlu0 %v248_v55, %s2577_s10  ;;  %513 = vrot.lane.b32.xlu1 %v248_v55, %s2578_s11  ;;  %2537 = vtanh.f32 %v330_v26 }
 0x221   :  { %2336 = vmatprep.mubr.msk.f32.mxu1 %vm339_vm3, %v248_v55 }
 0x222   :  { %2337 = vmatmul.mubr.msk.f32.vlgmr.msra.gmra.mxu1 %vm339_vm3, %v249_v56 }
 0x223   :  { %2343 = vmatprep.mubr.msk.f32.mxu1 %vm2575_vm1, %v2574_v6 }
 0x224   :  { %855 = vrot.lane.b32.xlu0 %v248_v55, %s2579_s12  ;;  %515 = vrot.lane.b32.xlu1 %v249_v56, %s2578_s11 }
 0x228   :  { %1026 = vrot.lane.b32.xlu0 %v248_v55, %s2580_s13  ;;  %686 = vrot.lane.b32.xlu1 %v249_v56, %s2577_s10 }
 0x22c   :  { %1197 = vrot.lane.b32.xlu0 %v248_v55, %s2581_s14  ;;  %857 = vrot.lane.b32.xlu1 %v249_v56, %s2579_s12  ;;  %v2812_v27 = vpop.eup %2535 }
 0x22d   :  { %v500_v28 = vrot.slane %v2812_v27, %v2753_v52  ;;  %v2816_v29 = vpop.eup %2537  ;;  %v671_v36 = vrot.slane %v2812_v27, %v257_v21  ;;  %v1013_v22 = vrot.slane %v2812_v27, %v1012_v20 }
 0x22e   :  { %v506_v31 = vrot.slane %v2816_v29, %v2753_v52  ;;  %v677_v39 = vrot.slane %v2816_v29, %v257_v21 }
 0x22f   :  { %v502_v30 = vmul.f32 %v500_v28, %v75_v10  ;;  %v501_v34 = vmul.f32 %v500_v28, %v74_v13  ;;  %v1019_v28 = vrot.slane %v2816_v29, %v1012_v20  ;;  %v1525_v20 = vsub.s32 6, %v2750_v51 }
 0x230   :  { %1368 = vrot.lane.b32.xlu0 %v248_v55, %s2582_s15  ;;  %1028 = vrot.lane.b32.xlu1 %v249_v56, %s2580_s13 }
 0x231   :  { %v508_v32 = vsub.f32 %v506_v31, %v502_v30  ;;  %v507_v37 = vsub.f32 %v506_v31, %v501_v34 }
 0x234   :  { %1539 = vrot.lane.b32.xlu0 %v248_v55, %s2583_s17  ;;  %1199 = vrot.lane.b32.xlu1 %v249_v56, %s2581_s14 }
 0x238   :  { %1370 = vrot.lane.b32.xlu1 %v249_v56, %s2582_s15 }
 0x23c   :  { %1541 = vrot.lane.b32.xlu1 %v249_v56, %s2583_s17 }
 0x292   :  { %v2760_v57 = vpop.permute.xlu0 %684  ;;  %v514_v58 = vpop.permute.xlu1 %513 }
 0x296   :  { %v2762_v59 = vpop.permute.xlu0 %855  ;;  %v516_v60 = vpop.permute.xlu1 %515 }
 0x29a   :  { %v1027_v61 = vpop.permute.xlu0 %1026  ;;  %v2764_v62 = vpop.permute.xlu1 %686 }
 0x29b   :  { %2384 = vmatprep.mubr.msk.f32.mxu0 %vm339_vm3, %v1027_v61 }
 0x29e   :  { %v2767_v63 = vpop.permute.xlu1 %857  ;;  %v1198_v1 = vpop.permute.xlu0 %1197 }
 0x2a2   :  { %v1029_v2 = vpop.permute.xlu1 %1028  ;;  %v1369_v4 = vpop.permute.xlu0 %1368 }
 0x2a3   :  { %2385 = vmatmul.mubr.msk.f32.vlgmr.msra.gmra.mxu0 %vm339_vm3, %v1029_v2 }
 0x2a4   :  { %2396 = vmatprep.mubr.msk.f32.mxu0 %vm339_vm3, %v1198_v1  ;;  %2395 = vmatpush3.msk.msra.mxu0 %vm346_vm2, %v2737_v47 }
 0x2a5   :  { %2406 = vmatprep.subr.msk.mxu0 %vm346_vm2, %v2737_v47 }
 0x2a6   :  { %v1200_v5 = vpop.permute.xlu1 %1199  ;;  %v1540_v8 = vpop.permute.xlu0 %1539 }
 0x2a7   :  { %2397 = vmatmul.mubr.msk.f32.vlgmr.msra.gmra.mxu0 %vm339_vm3, %v1200_v5  ;;  %v2883_v5 = vld [vmem:[%s3076_s1 + $0x1c8] sm:$0xff] }
 0x2a8   :  { %2408 = vmatprep.mubr.msk.f32.mxu0 %vm339_vm3, %v1369_v4  ;;  %2407 = vmatpush3.msk.msra.mxu0 %vm346_vm2, %v2737_v47 }
 0x2a9   :  { %2418 = vmatprep.subr.msk.mxu0 %vm346_vm2, %v2737_v47 }
 0x2aa   :  { %v1371_v7 = vpop.permute.xlu1 %1370 }
 0x2ab   :  { %2409 = vmatmul.mubr.msk.f32.vlgmr.msra.gmra.mxu0 %vm339_vm3, %v1371_v7  ;;  %v2888_v7 = vld [vmem:[%s3076_s1 + $0x1b0] sm:$0xff] }
 0x2ac   :  { %2420 = vmatprep.mubr.msk.f32.mxu0 %vm339_vm3, %v1540_v8  ;;  %2419 = vmatpush3.msk.msra.mxu0 %vm346_vm2, %v2737_v47  ;;  %v2897_v8 = vld [vmem:[%s3076_s1 + $0x198] sm:$0xff] }
 0x2ad   :  { %2430 = vmatprep.subr.mxu0 %v2574_v6 }
 0x2ae   :  { %v1542_v9 = vpop.permute.xlu1 %1541 }
 0x2af   :  { %2421 = vmatmul.mubr.msk.f32.vlgmr.msra.gmra.mxu0 %vm339_vm3, %v1542_v9  ;;  %v2902_v9 = vld [vmem:[%s3076_s1 + $0x180] sm:$0xff] }
 0x2b0   :  { %2446 = vmatprep.mubr.msk.f32.mxu0 %vm2575_vm1, %v2574_v6 }
 0x2e2   :  { %v2338_v11 = vpop.f32.mrf.mxu1 }
 0x2e3   :  { %v426_v12 = vmul.f32 %v2338_v11, %v75_v10  ;;  %v510_v33 = vmul.f32 %v2338_v11, %v508_v32 }
 0x2e4   :  { %v416_v14 = vpop.f32.mrf.mxu1 }
 0x2e5   :  { %v425_v15 = vmul.f32 %v416_v14, %v74_v13  ;;  %2340 = vmatpush3.msra.mxu1 %v426_v12  ;;  %v512_v35 = vadd.f32 %v510_v33, %v75_v10  ;;  %v509_v41 = vmul.f32 %v507_v37, %v416_v14  ;;  %v841_v10 = vsub.s32 2, %v2750_v51 }
 0x2e6   :  { %2341 = vmatprep.subr.mxu1 %v2574_v6 }
 0x2e7   :  { %2342 = vmatpush3.msra.mxu1 %v425_v15  ;;  %v673_v38 = vmul.f32 %v671_v36, %v512_v35  ;;  %v511_v45 = vadd.f32 %v509_v41, %v74_v13  ;;  %v842_v11 = vrot.slane %v2812_v27, %v841_v10  ;;  %v848_v13 = vrot.slane %v2816_v29, %v841_v10 }
 0x2e8   :  { %2344 = vmatmul.mubr.msk.f32.vlgmr.msra.gmra.mxu1 %vm86_vm0, %v2576_v46  ;;  %2346 = vmatprep.subr.msk.mxu1 %vm346_vm2, %v2737_v47 }
 0x2e9   :  { %2348 = vmatprep.mubr.msk.f32.mxu1 %vm339_vm3, %v514_v58  ;;  %2347 = vmatpush3.msk.msra.mxu1 %vm346_vm2, %v2737_v47  ;;  %v679_v43 = vsub.f32 %v677_v39, %v673_v38  ;;  %v672_v53 = vmul.f32 %v671_v36, %v511_v45  ;;  %v1183_v38 = vsub.s32 4, %v2750_v51 }
 0x2ea   :  { %2351 = vmatprep.subr.mxu1 %v2574_v6 }
 0x2eb   :  { %v678_v54 = vsub.f32 %v677_v39, %v672_v53 }
 0x2ec   :  { %2349 = vmatmul.mubr.msk.f32.vlgmr.msra.gmra.mxu1 %vm339_vm3, %v516_v60 }
 0x2ed   :  { %2355 = vmatprep.mubr.msk.f32.mxu1 %vm2575_vm1, %v2574_v6 }
 0x363   :  { %v2386_v41 = vpop.f32.mrf.mxu0 }
 0x365   :  { %v1100_v53 = vpop.f32.mrf.mxu0 }
 0x3a8   :  { %v2822_v40 = vpop.f32.mrf.mxu1 }
 0x3aa   :  { %v2345_v42 = vpop.f32.mrf.mxu1 }
 0x3ac   :  { %v2350_v44 = vpop.f32.mrf.mxu1 }
 0x3ad   :  { %v597_v48 = vmul.f32 %v2350_v44, %v512_v35  ;;  %v681_v49 = vmul.f32 %v2350_v44, %v679_v43  ;;  %v1184_v44 = vrot.slane %v2812_v27, %v1183_v38 }
 0x3ae   :  { %v587_v50 = vpop.f32.mrf.mxu1 }
 0x3af   :  { %v596_v52 = vmul.f32 %v587_v50, %v511_v45  ;;  %2352 = vmatpush3.msra.mxu1 %v597_v48  ;;  %v680_v56 = vmul.f32 %v678_v54, %v587_v50  ;;  %v683_v60 = vadd.f32 %v681_v49, %v512_v35  ;;  %v1190_v49 = vrot.slane %v2816_v29, %v1183_v38 }
 0x3b0   :  { %2353 = vmatprep.subr.mxu1 %v2574_v6 }
 0x3b1   :  { %2354 = vmatpush3.msra.mxu1 %v596_v52  ;;  %v682_v1 = vadd.f32 %v680_v56, %v511_v45  ;;  %v844_v12 = vmul.f32 %v842_v11, %v683_v60 }
 0x3b2   :  { %2356 = vmatmul.mubr.msk.f32.vlgmr.msra.gmra.mxu1 %vm86_vm0, %v2576_v46  ;;  %2358 = vmatprep.subr.msk.mxu1 %vm346_vm2, %v2737_v47 }
 0x3b3   :  { %2360 = vmatprep.mubr.msk.f32.mxu1 %vm339_vm3, %v2760_v57  ;;  %2359 = vmatpush3.msk.msra.mxu1 %vm346_vm2, %v2737_v47  ;;  %v843_v14 = vmul.f32 %v842_v11, %v682_v1  ;;  %v850_v15 = vsub.f32 %v848_v13, %v844_v12 }
 0x3b4   :  { %2363 = vmatprep.subr.mxu1 %v2574_v6 }
 0x3b5   :  { %v849_v17 = vsub.f32 %v848_v13, %v843_v14 }
 0x3b6   :  { %2361 = vmatmul.mubr.msk.f32.vlgmr.msra.gmra.mxu1 %vm339_vm3, %v2764_v62  ;;  %v2855_v62 = vld [vmem:[%s3076_s1 + $0x228] sm:$0xff] }
 0x3b7   :  { %2367 = vmatprep.mubr.msk.f32.mxu1 %vm2575_vm1, %v2574_v6  ;;  %1750 = vrot.lane.b32.xlu0 %v2855_v62, %s2573_s16 }
 0x472   :  { %v664_v55 = vpop.f32.mrf.mxu1 }
 0x473   :  { %v1695_v23 = vrot.slane %v664_v55, 7 }
 0x474   :  { %v2357_v58 = vpop.f32.mrf.mxu1 }
 0x475   :  { %v1716_v31 = vsel %vm1715_vm4, %v2822_v40, %v1695_v23 }
 0x476   :  { %v2362_v61 = vpop.f32.mrf.mxu1 }
 0x477   :  { %v768_v57 = vmul.f32 %v2362_v61, %v683_v60  ;;  %v852_v16 = vmul.f32 %v2362_v61, %v850_v15 }
 0x478   :  { %v758_v2 = vpop.f32.mrf.mxu1 }
 0x479   :  { %v767_v4 = vmul.f32 %v758_v2, %v682_v1  ;;  %2364 = vmatpush3.msra.mxu1 %v768_v57  ;;  %v851_v18 = vmul.f32 %v849_v17, %v758_v2  ;;  %v854_v19 = vadd.f32 %v852_v16, %v683_v60  ;;  %v1354_v60 = vsub.s32 5, %v2750_v51 }
 0x47a   :  { %2365 = vmatprep.subr.mxu1 %v2574_v6 }
 0x47b   :  { %2366 = vmatpush3.msra.mxu1 %v767_v4  ;;  %v853_v21 = vadd.f32 %v851_v18, %v682_v1  ;;  %v1015_v24 = vmul.f32 %v1013_v22, %v854_v19  ;;  %v2398_v1 = vpop.f32.mrf.mxu0  ;;  %v1355_v2 = vrot.slane %v2812_v27, %v1354_v60  ;;  %v1361_v11 = vrot.slane %v2816_v29, %v1354_v60 }
 0x47c   :  { %2368 = vmatmul.mubr.msk.f32.vlgmr.msra.gmra.mxu1 %vm86_vm0, %v2576_v46  ;;  %2370 = vmatprep.subr.msk.mxu1 %vm346_vm2, %v2737_v47 }
 0x47d   :  { %2372 = vmatprep.mubr.msk.f32.mxu1 %vm339_vm3, %v2762_v59  ;;  %2371 = vmatpush3.msk.msra.mxu1 %vm346_vm2, %v2737_v47  ;;  %v2860_v59 = vld [vmem:[%s3076_s1 + $0x210] sm:$0xff]  ;;  %v2869_v47 = vld [vmem:[%s3076_s1 + $0x1f8] sm:$0xff]  ;;  %v1014_v30 = vmul.f32 %v1013_v22, %v853_v21  ;;  %v1021_v34 = vsub.f32 %v1019_v28, %v1015_v24  ;;  %v1271_v14 = vpop.f32.mrf.mxu0  ;;  %v1526_v24 = vrot.slane %v2812_v27, %v1525_v20 }
 0x47e   :  { %2375 = vmatprep.subr.mxu1 %v2574_v6  ;;  %1748 = vrot.lane.b32.xlu1 %v2860_v59, %s2573_s16 }
 0x47f   :  { %1746 = vrot.lane.b32.xlu0 %v2869_v47, %s2573_s16  ;;  %v1020_v39 = vsub.f32 %v1019_v28, %v1014_v30  ;;  %v1532_v30 = vrot.slane %v2816_v29, %v1525_v20  ;;  %v70_v20 = vld [vmem:[%s3076_s1 + $0x1e8] sm:$0xff] }
 0x480   :  { %2373 = vmatmul.mubr.msk.f32.vlgmr.msra.gmra.mxu1 %vm339_vm3, %v2767_v63  ;;  %v2874_v63 = vld [vmem:[%s3076_s1 + $0x1e0] sm:$0xff] }
 0x481   :  { %2379 = vmatprep.mubr.msk.f32.mxu1 %vm2575_vm1, %v2574_v6 }
 0x482   :  { %1744 = vrot.lane.b32.xlu1 %v2874_v63, %s2573_s16 }
 0x483   :  { %1742 = vrot.lane.b32.xlu0 %v2883_v5, %s2573_s16 }
 0x486   :  { %1740 = vrot.lane.b32.xlu1 %v2888_v7, %s2573_s16 }
 0x487   :  { %1738 = vrot.lane.b32.xlu0 %v2897_v8, %s2573_s16 }
 0x48a   :  { %1736 = vrot.lane.b32.xlu1 %v2902_v9, %s2573_s16 }
 0x53c   :  { %v835_v25 = vpop.f32.mrf.mxu1 }
 0x53d   :  { %v1698_v26 = vrot.slane %v835_v25, 6 }
 0x53e   :  { %v2369_v32 = vpop.f32.mrf.mxu1 }
 0x53f   :  { %v2915_v33 = vsel %vm1717_vm5, %v1716_v31, %v1698_v26 }
 0x540   :  { %v2374_v35 = vpop.f32.mrf.mxu1 }
 0x541   :  { %v939_v36 = vmul.f32 %v2374_v35, %v854_v19  ;;  %v1023_v37 = vmul.f32 %v2374_v35, %v1021_v34 }
 0x542   :  { %v929_v42 = vpop.f32.mrf.mxu1 }
 0x543   :  { %v1025_v43 = vadd.f32 %v1023_v37, %v854_v19  ;;  %v938_v45 = vmul.f32 %v929_v42, %v853_v21  ;;  %v1022_v48 = vmul.f32 %v1020_v39, %v929_v42  ;;  %2376 = vmatpush3.msra.mxu1 %v939_v36 }
 0x544   :  { %2377 = vmatprep.subr.mxu1 %v2574_v6 }
 0x545   :  { %v1186_v40 = vmul.f32 %v1184_v44, %v1025_v43  ;;  %v1024_v50 = vadd.f32 %v1022_v48, %v853_v21  ;;  %2378 = vmatpush3.msra.mxu1 %v938_v45  ;;  %v1110_v52 = vmul.f32 %v2386_v41, %v1025_v43  ;;  %v2410_v21 = vpop.f32.mrf.mxu0  ;;  %v63_v45 = vld [vmem:[%s3076_s1 + $0x2b8] sm:$0xff]  ;;  %v62_v48 = vld [vmem:[%s3076_s1 + $0x2a0] sm:$0xff] }
 0x546   :  { %2380 = vmatmul.mubr.msk.f32.vlgmr.msra.gmra.mxu1 %vm86_vm0, %v2576_v46  ;;  %2387 = vmatprep.subr.mxu1 %v2574_v6 }
 0x547   :  { %v1192_v54 = vsub.f32 %v1190_v49, %v1186_v40  ;;  %v1185_v55 = vmul.f32 %v1184_v44, %v1024_v50  ;;  %2388 = vmatpush3.msra.mxu1 %v1110_v52  ;;  %v1109_v56 = vmul.f32 %v1100_v53, %v1024_v50  ;;  %2391 = vmatprep.mubr.msk.f32.mxu1 %vm2575_vm1, %v2574_v6  ;;  %v1442_v31 = vpop.f32.mrf.mxu0  ;;  %v64_v44 = vld [vmem:[%s3076_s1 + $0x2d0] sm:$0xff]  ;;  %v61_v40 = vld [vmem:[%s3076_s1 + $0x288] sm:$0xff]  ;;  %v1749_v52 = vpop.permute.xlu1 %1748 }
 0x548   :  { %2389 = vmatprep.subr.mxu1 %v2574_v6 }
 0x549   :  { %v1194_v58 = vmul.f32 %v2386_v41, %v1192_v54  ;;  %v1191_v61 = vsub.f32 %v1190_v49, %v1185_v55  ;;  %2390 = vmatpush3.msra.mxu1 %v1109_v56  ;;  %v2422_v37 = vpop.f32.mrf.mxu0  ;;  %v60_v49 = vld [vmem:[%s3076_s1 + $0x270] sm:$0xff] }
 0x54a   :  { %2392 = vmatmul.mubr.msk.f32.vlgmr.msra.gmra.mxu1 %vm86_vm0, %v2576_v46  ;;  %2399 = vmatprep.subr.mxu1 %v2574_v6 }
 0x54b   :  { %v1196_v57 = vadd.f32 %v1194_v58, %v1025_v43  ;;  %v1193_v4 = vmul.f32 %v1191_v61, %v1100_v53  ;;  %2403 = vmatprep.mubr.msk.f32.mxu1 %vm2575_vm1, %v2574_v6  ;;  %v1613_v41 = vpop.f32.mrf.mxu0  ;;  %v65_v43 = vld [vmem:[%s3076_s1 + $0x2e8] sm:$0xff] }
 0x54d   :  { %v1357_v10 = vmul.f32 %v1355_v2, %v1196_v57  ;;  %v1195_v12 = vadd.f32 %v1193_v4, %v1024_v50  ;;  %v1281_v13 = vmul.f32 %v2398_v1, %v1196_v57  ;;  %v1751_v50 = vpop.permute.xlu0 %1750 }
 0x54e   :  { %2431 = vmatpush3.msra.mxu0 %v1751_v50 }
 0x54f   :  { %v1363_v15 = vsub.f32 %v1361_v11, %v1357_v10  ;;  %v1356_v16 = vmul.f32 %v1355_v2, %v1195_v12  ;;  %2400 = vmatpush3.msra.mxu1 %v1281_v13  ;;  %v1280_v17 = vmul.f32 %v1271_v14, %v1195_v12  ;;  %2432 = vmatprep.subr.mxu0 %v2574_v6 }
 0x550   :  { %2401 = vmatprep.subr.mxu1 %v2574_v6  ;;  %2433 = vmatpush3.msra.mxu0 %v1749_v52 }
 0x551   :  { %v1362_v18 = vsub.f32 %v1361_v11, %v1356_v16  ;;  %2402 = vmatpush3.msra.mxu1 %v1280_v17  ;;  %v1365_v19 = vmul.f32 %v2398_v1, %v1363_v15  ;;  %v1747_v53 = vpop.permute.xlu0 %1746  ;;  %2434 = vmatprep.subr.mxu0 %v2574_v6 }
 0x552   :  { %2404 = vmatmul.mubr.msk.f32.vlgmr.msra.gmra.mxu1 %vm86_vm0, %v2576_v46  ;;  %2411 = vmatprep.subr.mxu1 %v2574_v6 }
 0x553   :  { %v1367_v22 = vadd.f32 %v1365_v19, %v1196_v57  ;;  %v1364_v23 = vmul.f32 %v1362_v18, %v1271_v14  ;;  %2415 = vmatprep.mubr.msk.f32.mxu1 %vm2575_vm1, %v2574_v6  ;;  %2435 = vmatpush3.msra.mxu0 %v1747_v53  ;;  %v72_v18 = vld [vmem:[%s3076_s1 + $0x218] sm:$0xff]  ;;  %v71_v19 = vld [vmem:[%s3076_s1 + $0x200] sm:$0xff] }
 0x554   :  { %2436 = vmatprep.subr.mxu0 %v2574_v6 }
 0x555   :  { %v1452_v25 = vmul.f32 %v2410_v21, %v1367_v22  ;;  %v1366_v26 = vadd.f32 %v1364_v23, %v1195_v12  ;;  %v1528_v28 = vmul.f32 %v1526_v24, %v1367_v22  ;;  %v67_v23 = vld [vmem:[%s3076_s1 + $0x1a0] sm:$0xff] }
 0x557   :  { %2412 = vmatpush3.msra.mxu1 %v1452_v25  ;;  %v1451_v51 = vmul.f32 %v1442_v31, %v1366_v26  ;;  %v1534_v32 = vsub.f32 %v1532_v30, %v1528_v28  ;;  %v1527_v34 = vmul.f32 %v1526_v24, %v1366_v26  ;;  %v66_v24 = vld [vmem:[%s3076_s1 + $0x188] sm:$0xff]  ;;  %v79_v25 = vld [vmem:[%s3076_s1 + $0x310] ss:$0 sm:$0xff] }
 0x558   :  { %2413 = vmatprep.subr.mxu1 %v2574_v6 }
 0x559   :  { %2414 = vmatpush3.msra.mxu1 %v1451_v51  ;;  %v1536_v35 = vmul.f32 %v2410_v21, %v1534_v32  ;;  %v1533_v36 = vsub.f32 %v1532_v30, %v1527_v34  ;;  %v69_v21 = vld [vmem:[%s3076_s1 + $0x1d0] sm:$0xff] }
 0x55a   :  { %2416 = vmatmul.mubr.msk.f32.vlgmr.msra.gmra.mxu1 %vm86_vm0, %v2576_v46  ;;  %2423 = vmatprep.subr.mxu1 %v2574_v6 }
 0x55b   :  { %v1538_v27 = vadd.f32 %v1536_v35, %v1367_v22  ;;  %v1535_v38 = vmul.f32 %v1533_v36, %v1442_v31  ;;  %2427 = vmatprep.mubr.msk.f32.mxu1 %vm2575_vm1, %v2574_v6  ;;  %v68_v22 = vld [vmem:[%s3076_s1 + $0x1b8] sm:$0xff] }
 0x55d   :  { %v1623_v29 = vmul.f32 %v2422_v37, %v1538_v27  ;;  %v1537_v39 = vadd.f32 %v1535_v38, %v1366_v26  ;;  %v2584_v26 = vmov 64  }
 0x55e   :  { %2526 = vset.pattern.permute.xlu0 %v2584_v26 }
 0x55f   :  { %2424 = vmatpush3.msra.mxu1 %v1623_v29  ;;  %v1622_v42 = vmul.f32 %v1613_v41, %v1537_v39  ;;  %1908 = vperm.xlu0 %2526, %v79_v25  }
 0x560   :  { %2425 = vmatprep.subr.mxu1 %v2574_v6 }
 0x561   :  { %2426 = vmatpush3.msra.mxu1 %v1622_v42 }
 0x562   :  { %2428 = vmatmul.mubr.msk.f32.vlgmr.msra.gmra.mxu1 %vm86_vm0, %v2576_v46  ;;  %2449 = vmatprep.subr.mxu1 %v2574_v6 }
 0x563   :  { %2481 = vmatprep.mubr.msk.f32.mxu1 %vm2575_vm1, %v2574_v6  ;;  %2450 = vmatpush3.msra.mxu1 %v65_v43 }
 0x564   :  { %2451 = vmatprep.subr.mxu1 %v2574_v6 }
 0x565   :  { %2452 = vmatpush3.msra.mxu1 %v64_v44 }
 0x566   :  { %2453 = vmatprep.subr.mxu1 %v2574_v6 }
 0x567   :  { %2454 = vmatpush3.msra.mxu1 %v63_v45 }
 0x568   :  { %2455 = vmatprep.subr.mxu1 %v2574_v6 }
 0x569   :  { %2456 = vmatpush3.msra.mxu1 %v62_v48 }
 0x56a   :  { %2457 = vmatprep.subr.mxu1 %v2574_v6 }
 0x56b   :  { %2458 = vmatpush3.msra.mxu1 %v61_v40 }
 0x56c   :  { %2459 = vmatprep.subr.mxu1 %v2574_v6 }
 0x56d   :  { %2460 = vmatpush3.msra.mxu1 %v60_v49 }
 0x56e   :  { %2461 = vmatprep.subr.mxu1 %v2574_v6 }
 0x56f   :  { %2462 = vmatpush3.msra.mxu1 %v2622_v3  ;;  %v1745_v3 = vpop.permute.xlu1 %1744 }
 0x570   :  { %2463 = vmatprep.subr.mxu1 %v2574_v6  ;;  %2437 = vmatpush3.msra.mxu0 %v1745_v3 }
 0x571   :  { %2464 = vmatpush3.msra.mxu1 %v2609_v0  ;;  %v1743_v0 = vpop.permute.xlu0 %1742  ;;  %2438 = vmatprep.subr.mxu0 %v2574_v6 }
 0x572   :  { %2465 = vmatprep.subr.mxu1 %v2574_v6  ;;  %2439 = vmatpush3.msra.mxu0 %v1743_v0 }
 0x573   :  { %2466 = vmatpush3.msra.mxu1 %v2855_v62  ;;  %v1741_v62 = vpop.permute.xlu1 %1740  ;;  %2440 = vmatprep.subr.mxu0 %v2574_v6 }
 0x574   :  { %2467 = vmatprep.subr.mxu1 %v2574_v6  ;;  %2441 = vmatpush3.msra.mxu0 %v1741_v62 }
 0x575   :  { %2468 = vmatpush3.msra.mxu1 %v2860_v59  ;;  %v1739_v59 = vpop.permute.xlu0 %1738  ;;  %2442 = vmatprep.subr.mxu0 %v2574_v6 }
 0x576   :  { %2469 = vmatprep.subr.mxu1 %v2574_v6  ;;  %2443 = vmatpush3.msra.mxu0 %v1739_v59 }
 0x577   :  { %2470 = vmatpush3.msra.mxu1 %v2869_v47  ;;  %v1737_v47 = vpop.permute.xlu1 %1736  ;;  %2444 = vmatprep.subr.mxu0 %v2574_v6 }
 0x578   :  { %2471 = vmatprep.subr.mxu1 %v2574_v6  ;;  %2445 = vmatpush3.msra.mxu0 %v1737_v47 }
 0x579   :  { %2472 = vmatpush3.msra.mxu1 %v2874_v63  ;;  %v3007_v63 = vld [vmem:[%s3075_s0 + $0x10] sm:$0xff]  ;;  %2484 = vmatprep.subr.mxu0 %v2574_v6 }
 0x57a   :  { %2473 = vmatprep.subr.mxu1 %v2574_v6  ;;  %2447 = vmatmul.mubr.msk.f32.vlgmr.msra.gmra.mxu0 %vm1760_vm6, %v3007_v63  ;;  %vm1991_vm11 = vcmp.ge.f32.partialorder %v3007_v63, 0.0 }
 0x57b   :  { %2474 = vmatpush3.msra.mxu1 %v2883_v5  ;;  %2500 = vmatprep.mubr.msk.f32.mxu0 %vm2575_vm1, %v2574_v6  ;;  %v1992_v28 = vsel %vm1991_vm11, 1.0, %v2574_v6 }
 0x57c   :  { %2475 = vmatprep.subr.mxu1 %v2574_v6  ;;  %2008 = vrot.lane.b32.xlu1 %v1992_v28, %s2573_s16 }
 0x57d   :  { %2476 = vmatpush3.msra.mxu1 %v2888_v7 }
 0x57e   :  { %2477 = vmatprep.subr.mxu1 %v2574_v6 }
 0x57f   :  { %2478 = vmatpush3.msra.mxu1 %v2897_v8 }
 0x580   :  { %2479 = vmatprep.subr.mxu1 %v2574_v6  ;;  %1994 = vrot.lane.b32.xlu1 %v3007_v63, %s2573_s16 }
 0x581   :  { %2480 = vmatpush3.msra.mxu1 %v2902_v9 }
 0x582   :  { %2508 = vmatprep.subr.mxu1 %v2574_v6 }
 0x5da   :  { %v1909_v37 = vpop.permute.xlu0 %1908 }
 0x5ee   :  { %v2009_v35 = vpop.permute.xlu1 %2008 }
 0x5ef   :  { %v2088_v36 = vsel %vm339_vm3, %v2009_v35, 0.0 }
 0x5f0   :  { %2089 = vadd.xlane.f32.xlu0 %v2088_v36 }
 0x606   :  { %v1006_v5 = vpop.f32.mrf.mxu1 }
 0x607   :  { %v1701_v61 = vrot.slane %v1006_v5, 5 }
 0x608   :  { %v2381_v7 = vpop.f32.mrf.mxu1 }
 0x609   :  { %v1720_v2 = vsel %vm1719_vm7, %v2915_v33, %v1701_v61  ;;  %v73_v33 = vld [vmem:[%s3076_s1 + $0x230] sm:$0xff] }
 0x60a   :  { %v1177_v8 = vpop.f32.mrf.mxu1  ;;  %2485 = vmatpush3.msra.mxu0 %v73_v33 }
 0x60b   :  { %v1704_v1 = vrot.slane %v1177_v8, 4  ;;  %2486 = vmatprep.subr.mxu0 %v2574_v6 }
 0x60c   :  { %v2393_v54 = vpop.f32.mrf.mxu1  ;;  %2487 = vmatpush3.msra.mxu0 %v72_v18 }
 0x60d   :  { %v1721_v4 = vsel %vm346_vm2, %v1720_v2, %v1704_v1  ;;  %2488 = vmatprep.subr.mxu0 %v2574_v6 }
 0x60e   :  { %2489 = vmatpush3.msra.mxu0 %v71_v19 }
 0x60f   :  { %2490 = vmatprep.subr.mxu0 %v2574_v6 }
 0x610   :  { %2491 = vmatpush3.msra.mxu0 %v70_v20 }
 0x611   :  { %2492 = vmatprep.subr.mxu0 %v2574_v6 }
 0x612   :  { %v1348_v55 = vpop.f32.mrf.mxu1  ;;  %2493 = vmatpush3.msra.mxu0 %v69_v21 }
 0x613   :  { %v1707_v57 = vrot.slane %v1348_v55, 3  ;;  %2494 = vmatprep.subr.mxu0 %v2574_v6 }
 0x614   :  { %v2405_v56 = vpop.f32.mrf.mxu1  ;;  %2495 = vmatpush3.msra.mxu0 %v68_v22 }
 0x615   :  { %v1723_v11 = vsel %vm1722_vm8, %v1721_v4, %v1707_v57  ;;  %2496 = vmatprep.subr.mxu0 %v2574_v6 }
 0x616   :  { %2497 = vmatpush3.msra.mxu0 %v67_v23 }
 0x617   :  { %2498 = vmatprep.subr.mxu0 %v2574_v6 }
 0x618   :  { %2499 = vmatpush3.msra.mxu0 %v66_v24 }
 0x619   :  { %2503 = vmatprep.subr.mxu0 %v2574_v6 }
 0x61a   :  { %v1519_v58 = vpop.f32.mrf.mxu1 }
 0x61b   :  { %v1710_v9 = vrot.slane %v1519_v58, 2 }
 0x61c   :  { %v2417_v60 = vpop.f32.mrf.mxu1 }
 0x61d   :  { %v1725_v13 = vsel %vm1724_vm9, %v1723_v11, %v1710_v9 }
 0x622   :  { %v1690_v10 = vpop.f32.mrf.mxu1 }
 0x623   :  { %v1713_v12 = vrot.slane %v1690_v10, 1 }
 0x624   :  { %v2429_v14 = vpop.f32.mrf.mxu1 }
 0x625   :  { %v1727_v15 = vsel %vm1726_vm10, %v1725_v13, %v1713_v12 }
 0x626   :  { %2482 = vmatmul.mubr.f32.vlgmr.msra.gmra.mxu1 %v1727_v15 }
 0x627   :  { %2510 = vmatprep.mubr.msk.f32.mxu1 %vm2575_vm1, %v2574_v6 }
 0x63a   :  { %v1830_v16 = vpop.f32.mrf.mxu0 }
 0x63c   :  { %v2448_v17 = vpop.f32.mrf.mxu0 }
 0x679   :  { %v2090_v53 = vpop.xlane.xlu0 %2089 }
 0x67a   :  { %2509 = vmatpush3.msra.mxu1 %v2090_v53 }
 0x67b   :  { %2511 = vmatmul.mubr.msk.f32.vlgmr.msra.gmra.mxu1 %vm2015_vm12, %v2576_v46 }
 0x6e6   :  { %v1900_v30 = vpop.f32.mrf.mxu1 }
 0x6e7   :  { %v1901_v31 = vadd.f32 %v1900_v30, %v1830_v16 }
 0x6e8   :  { %v2483_v51 = vpop.f32.mrf.mxu1 }
 0x6e9   :  { %v1904_v32 = vadd.f32 %v1901_v31, %v79_v25 }
 0x6eb   :  { %2539 = vtanh.f32 %v1904_v32 }
 0x6f8   :  { %v2540_v34 = vpop.eup %2539 }
 0x6f9   :  { %2501 = vmatmul.mubr.msk.f32.vlgmr.msra.gmra.mxu0 %vm1760_vm6, %v2540_v34 }
 0x6fa   :  { %2505 = vmatprep.mubr.msk.f32.mxu0 %vm2575_vm1, %v2574_v6  ;;  %v1995_v6 = vpop.permute.xlu1 %1994 }
 0x73b   :  { %v2157_v7 = vpop.f32.mrf.mxu1 }
 0x73c   :  { %v2161_v54 = vmax.f32 %v2157_v7, 1.0 }
 0x73d   :  { %v2512_v8 = vpop.f32.mrf.mxu1 }
 0x7b9   :  { %v1980_v27 = vpop.f32.mrf.mxu0 }
 0x7ba   :  { %v1981_v38 = vadd.f32 %v1980_v27, %v1909_v37 }
 0x7bb   :  { %v2502_v29 = vpop.f32.mrf.mxu0 }
 0x7bc   :  { %v2223_v39 = vmul.f32 -1.442695, %v1981_v38  ;;  %v1999_v41 = vand.u32 2147483647, %v1981_v38  ;;  %v1993_v50 = vmax.f32 %v1981_v38, 0.0  ;;  %v1997_v52 = vmul.f32 %v1995_v6, %v1981_v38 }
 0x7be   :  { %2541 = vpow2.f32 %v2223_v39  ;;  %v2000_v42 = vsub.f32 0.0, %v1999_v41  ;;  %v1998_v0 = vsub.f32 %v1993_v50, %v1997_v52 }
 0x7c0   :  { %v2001_v43 = vmul.f32 1.442695, %v2000_v42 }
 0x7c2   :  { %2543 = vpow2.f32 %v2001_v43 }
 0x7cb   :  { %v2542_v44 = vpop.eup %2541 }
 0x7cc   :  { %v1987_v45 = vadd.f32 1.0, %v2542_v44 }
 0x7ce   :  { %2545 = vrcp.f32 %v1987_v45 }
 0x7cf   :  { %v2544_v48 = vpop.eup %2543 }
 0x7d0   :  { %v2003_v40 = vadd.f32 1.0, %v2544_v48 }
 0x7d2   :  { %2547 = vlog2.f32 %v2003_v40 }
 0x7d3   :  { %2549 = vrcp.f32 %v2161_v54 }
 0x7db   :  { %v2546_v49 = vpop.eup %2545 }
 0x7dc   :  { %1990 = vst.msk [vmem:[%s3078_s3] sm:$0xff] %vm339_vm3, %v2546_v49  ;;  %s2585_s3 = smov [#allocation2]  }
 0x7dd   :  { %s2172_s19 = sshll.u32 %s2585_s3, 4  ;;  %s2173_s19 = int_to_ptr.vmem [resolvable:$true] %s2172_s19 }
 0x7de   :  { %s2551_s20 = scalar_lea.vmem %s2173_s19, 16  ;;  %s2555_s21 = scalar_lea.vmem %s2173_s19, 32 }
 0x7df   :  { %v2548_v3 = vpop.eup %2547  ;;  %p2552_p0 = scmp.ne.s32.totalorder %s2173_s19, %s2551_s20  ;;  %p2556_p1 = scmp.lt.s32.totalorder %s2173_s19, %s2173_s19 }
 0x7e0   :  { %v2005_v62 = vmul.f32 0.6931472, %v2548_v3  ;;  %v2550_v55 = vpop.eup %2549  ;;  %p2557_p2 = scmp.lt.s32.totalorder %s2555_s21, %s2551_s20 }
 0x7e2   :  { %v2006_v59 = vadd.f32 %v2005_v62, %v1998_v0  ;;  %p2558_p3 = por %p2557_p2, %p2556_p1 }
 0x7e4   :  { %v2011_v47 = vmul.f32 %v2009_v35, %v2006_v59  ;;  %p2559_p4 = pnand %p2558_p3, %p2552_p0 }
 0x7e6   :  { %v2012_v63 = vsel %vm339_vm3, %v2011_v47, 0.0 }
 0x7e7   :  { %2013 = vadd.xlane.f32.xlu1 %v2012_v63 }
 0x870   :  { %v2014_v5 = vpop.xlane.xlu1 %2013 }
 0x871   :  { %2504 = vmatpush3.msra.mxu0 %v2014_v5 }
 0x872   :  { %2506 = vmatmul.mubr.msk.f32.vlgmr.msra.gmra.mxu0 %vm2015_vm12, %v2576_v46 }
 0x932   :  { %v2084_v56 = vpop.f32.mrf.mxu0 }
 0x933   :  { %v2163_v58 = vmul.f32 %v2550_v55, %v2084_v56 }
 0x934   :  { %v2507_v60 = vpop.f32.mrf.mxu0 }
 0x935   :  { %2165 = vst.msk [vmem:[#allocation2] sm:$0x1] %vm2164_vm13, %v2163_v58 }
 0x936   :  { %2562 = shalt.err (!%p2559_p4)
}
 0x937   :  { %2175 = dma.vmem_to_hbm [thread:$0]  %s2173_s19, 16, %s3077_s2, [#allocation3]  }
 0x938   :  { %2571 = dma.done.wait [#allocation3], 16  }
 0x939   :  { %2572 = vsyncadd [#allocation3], 4294967280 }
 0x93a   :  { %2183 = vsyncpa [#allocation3], 1 }

</bundles_post_ra>
